<compile_context>
chip_gen: v7x
topology: tpu7x:2x2x1
jax: 0.10.0
libtpu: 0.0.40
codegen_flags: <defaults>
</compile_context>

<pallas_src>
import jax
import jax.numpy as jnp
from jax.experimental import pallas as pl
from jax.experimental.pallas import tpu as pltpu


def mlp_kernel(x_ref, w1_ref, w2_ref, w3_ref, w4_ref,
               b1_ref, b2_ref, b3_ref, b4_ref, o_ref):
    # x tile: (tm, D) f32 -> cast to bf16 for the MXU; accumulate / epilogue in f32.
    x = x_ref[...].astype(jnp.bfloat16)

    h = jnp.dot(x, w1_ref[...], preferred_element_type=jnp.float32) + b1_ref[...]
    h = jnp.maximum(h, 0.0).astype(jnp.bfloat16)

    h = jnp.dot(h, w2_ref[...], preferred_element_type=jnp.float32) + b2_ref[...]
    h = jnp.maximum(h, 0.0).astype(jnp.bfloat16)

    h = jnp.dot(h, w3_ref[...], preferred_element_type=jnp.float32) + b3_ref[...]
    h = jnp.maximum(h, 0.0).astype(jnp.bfloat16)

    logits = jnp.dot(h, w4_ref[...], preferred_element_type=jnp.float32) + b4_ref[...]

    # softmax over dim=1 (class axis), max-stabilized, exact division in f32.
    m = jnp.max(logits, axis=-1, keepdims=True)
    e = jnp.exp(logits - m)
    denom = jnp.sum(e, axis=-1, keepdims=True)
    o_ref[...] = (e / denom).astype(o_ref.dtype)


def _round_up(v, m):
    return (v + m - 1) // m * m


def _pick_tile(B, tile_m):
    """Batch tile: multiple of 16 (bf16 sublane packing); keep >=2 grid steps when we can
    (v7x megacore + DMA/compute overlap) without shrinking tiles below 16 rows."""
    tile_m = max(16, _round_up(tile_m, 16))
    if B > tile_m:
        return tile_m
    if B >= 32:
        return max(16, _round_up(pl.cdiv(B, 2), 16))
    return max(16, _round_up(B, 16))


def net_forward(x, params, *, tile_m=2048):
    """x: (B, input_dim) float32. params: transposed (in,out) f32 weights / (1,out) biases."""
    B, D = x.shape
    n_classes = params["w4"].shape[1]

    # One-time weight cast (in a serving loop this lives outside the step).
    w1 = params["w1"].astype(jnp.bfloat16)   # (D, 32)
    w2 = params["w2"].astype(jnp.bfloat16)   # (32, 32)
    w3 = params["w3"].astype(jnp.bfloat16)   # (32, 32)
    w4 = params["w4"].astype(jnp.bfloat16)   # (32, 5)
    b1 = params["b1"].astype(jnp.float32)    # (1, 32)
    b2 = params["b2"].astype(jnp.float32)
    b3 = params["b3"].astype(jnp.float32)
    b4 = params["b4"].astype(jnp.float32)    # (1, 5)

    tm = _pick_tile(B, tile_m)
    grid = (pl.cdiv(B, tm),)
    Bp = grid[0] * tm  # logical padded extent; tail rows are garbage and discarded below.

    weight_bytes = sum(int(a.size) * a.dtype.itemsize
                       for a in (w1, w2, w3, w4, b1, b2, b3, b4))

    # VMEM budget: x/out double-buffered + resident params + headroom for intermediates.
    vmem_est = (2 * tm * (D + n_classes) * 4
                + weight_bytes
                + 4 * tm * 32 * 4
                + (2 << 20))
    vmem_limit = min(max(vmem_est, 32 * 1024 * 1024), 120 * 1024 * 1024)

    flops = 2 * B * (D * 32 + 32 * 32 + 32 * 32 + 32 * n_classes)
    cost = pl.CostEstimate(
        flops=flops,
        transcendentals=B * n_classes,
        bytes_accessed=B * D * 4 + B * n_classes * 4 + weight_bytes,
    )

    const_spec = lambda shape: pl.BlockSpec(shape, lambda i: (0, 0))

    out = pl.pallas_call(
        mlp_kernel,
        out_shape=jax.ShapeDtypeStruct((Bp, n_classes), jnp.float32),
        grid=grid,
        in_specs=[
            pl.BlockSpec((tm, D), lambda i: (i, 0)),   # x: tiled over batch
            const_spec(w1.shape),                      # params: VMEM-resident
            const_spec(w2.shape),
            const_spec(w3.shape),
            const_spec(w4.shape),
            const_spec(b1.shape),
            const_spec(b2.shape),
            const_spec(b3.shape),
            const_spec(b4.shape),
        ],
        out_specs=pl.BlockSpec((tm, n_classes), lambda i: (i, 0)),
        compiler_params=pltpu.CompilerParams(
            dimension_semantics=("parallel",),
            vmem_limit_bytes=vmem_limit,
        ),
        cost_estimate=cost,
    )(x, w1, w2, w3, w4, b1, b2, b3, b4)

    return out[:B] if Bp != B else out


def net_forward_ref(x, params):
    """Pure-JAX f32 reference of Net.forward."""
    h = jnp.maximum(x @ params["w1"] + params["b1"], 0.0)
    h = jnp.maximum(h @ params["w2"] + params["b2"], 0.0)
    h = jnp.maximum(h @ params["w3"] + params["b3"], 0.0)
    logits = h @ params["w4"] + params["b4"]
    return jax.nn.softmax(logits, axis=1)


def init_params(key, input_dim):
    """Deterministic init mimicking nn.Linear default (uniform +/- 1/sqrt(fan_in)).
    Weights stored already transposed to (in, out); biases as (1, out). Kept f32."""
    dims = [(input_dim, 32), (32, 32), (32, 32), (32, 5)]
    params = {}
    for i, (fan_in, fan_out) in enumerate(dims, start=1):
        key, kw, kb = jax.random.split(key, 3)
        bound = 1.0 / jnp.sqrt(jnp.float32(fan_in))
        params[f"w{i}"] = jax.random.uniform(
            kw, (fan_in, fan_out), jnp.float32, -bound, bound)
        params[f"b{i}"] = jax.random.uniform(
            kb, (1, fan_out), jnp.float32, -bound, bound)
    return params


if __name__ == "__main__":
    key = jax.random.PRNGKey(0)
    k_x, k_p = jax.random.split(key)

    batch = 32
    input_dim = 40  # synthetic stand-in for (roberta 768 + tabular) feature dim

    x = jax.random.normal(k_x, (batch, input_dim), jnp.float32)
    params = init_params(k_p, input_dim)

    # B=32 -> tm=16, grid=(2,): exercises the tiled/parallel path even at this small batch.
    out = net_forward(x, params)
    out = jax.block_until_ready(out)

    ref = net_forward_ref(x, params)

    # sanity: shape, softmax rows sum to 1 (exact division), close to f32 reference (bf16 MXU)
    assert out.shape == (batch, 5)
    assert jnp.allclose(jnp.sum(out, axis=1), 1.0, atol=1e-4)
    assert jnp.allclose(out, ref, atol=3e-2)

    print("KERNEL_OK")
</pallas_src>

<mosaic_0001>
module attributes {stable_mosaic.version = 11 : i64} {
  func.func @mlp_kernel(%arg0: i32, %arg1: memref<16x40xf32, #tpu.memory_space<vmem>>, %arg2: memref<40x32xbf16, #tpu.memory_space<vmem>>, %arg3: memref<32x32xbf16, #tpu.memory_space<vmem>>, %arg4: memref<32x32xbf16, #tpu.memory_space<vmem>>, %arg5: memref<32x5xbf16, #tpu.memory_space<vmem>>, %arg6: memref<1x32xf32, #tpu.memory_space<vmem>>, %arg7: memref<1x32xf32, #tpu.memory_space<vmem>>, %arg8: memref<1x32xf32, #tpu.memory_space<vmem>>, %arg9: memref<1x5xf32, #tpu.memory_space<vmem>>, %arg10: memref<16x5xf32, #tpu.memory_space<vmem>>) attributes {dimension_semantics = [#tpu.dimension_semantics<parallel>], iteration_bounds = array<i64: 2>, scalar_prefetch = 0 : i64, scratch_operands = 0 : i64, tpu.core_type = #tpu.core_type<tc>, window_params = [{transform_indices = @transform_0, window_bounds = array<i64: 16, 40>}, {pipeline_mode = #tpu.pipeline_mode<synchronous>, transform_indices = @transform_1, window_bounds = array<i64: 40, 32>}, {pipeline_mode = #tpu.pipeline_mode<synchronous>, transform_indices = @transform_2, window_bounds = array<i64: 32, 32>}, {pipeline_mode = #tpu.pipeline_mode<synchronous>, transform_indices = @transform_3, window_bounds = array<i64: 32, 32>}, {pipeline_mode = #tpu.pipeline_mode<synchronous>, transform_indices = @transform_4, window_bounds = array<i64: 32, 5>}, {pipeline_mode = #tpu.pipeline_mode<synchronous>, transform_indices = @transform_5, window_bounds = array<i64: 1, 32>}, {pipeline_mode = #tpu.pipeline_mode<synchronous>, transform_indices = @transform_6, window_bounds = array<i64: 1, 32>}, {pipeline_mode = #tpu.pipeline_mode<synchronous>, transform_indices = @transform_7, window_bounds = array<i64: 1, 32>}, {pipeline_mode = #tpu.pipeline_mode<synchronous>, transform_indices = @transform_8, window_bounds = array<i64: 1, 5>}, {transform_indices = @transform_9, window_bounds = array<i64: 16, 5>}]} {
    %c0 = arith.constant 0 : index
    %c0_0 = arith.constant 0 : index
    %0 = vector.load %arg1[%c0, %c0_0] : memref<16x40xf32, #tpu.memory_space<vmem>>, vector<16x40xf32>
    %1 = arith.truncf %0 : vector<16x40xf32> to vector<16x40xbf16>
    %c0_1 = arith.constant 0 : index
    %c0_2 = arith.constant 0 : index
    %2 = vector.load %arg2[%c0_1, %c0_2] : memref<40x32xbf16, #tpu.memory_space<vmem>>, vector<40x32xbf16>
    %cst = arith.constant dense<0.000000e+00> : vector<16x32xf32>
    %3 = tpu.matmul %1, %2, %cst {dimension_numbers = #tpu.dot_dimension_numbers<[1], [0], [0], [1], [0, 0, 1, 1], [], []>} : vector<16x40xbf16>, vector<40x32xbf16>, vector<16x32xf32> -> vector<16x32xf32>
    %c0_3 = arith.constant 0 : index
    %c0_4 = arith.constant 0 : index
    %4 = vector.load %arg6[%c0_3, %c0_4] : memref<1x32xf32, #tpu.memory_space<vmem>>, vector<1x32xf32>
    %5 = vector.broadcast %4 : vector<1x32xf32> to vector<16x32xf32>
    %6 = arith.addf %3, %5 : vector<16x32xf32>
    %cst_5 = arith.constant 0.000000e+00 : f32
    %7 = vector.broadcast %cst_5 : f32 to vector<16x32xf32>
    %8 = arith.maximumf %6, %7 : vector<16x32xf32>
    %9 = arith.truncf %8 : vector<16x32xf32> to vector<16x32xbf16>
    %c0_6 = arith.constant 0 : index
    %c0_7 = arith.constant 0 : index
    %10 = vector.load %arg3[%c0_6, %c0_7] : memref<32x32xbf16, #tpu.memory_space<vmem>>, vector<32x32xbf16>
    %cst_8 = arith.constant dense<0.000000e+00> : vector<16x32xf32>
    %11 = tpu.matmul %9, %10, %cst_8 {dimension_numbers = #tpu.dot_dimension_numbers<[1], [0], [0], [1], [0, 0, 1, 1], [], []>} : vector<16x32xbf16>, vector<32x32xbf16>, vector<16x32xf32> -> vector<16x32xf32>
    %c0_9 = arith.constant 0 : index
    %c0_10 = arith.constant 0 : index
    %12 = vector.load %arg7[%c0_9, %c0_10] : memref<1x32xf32, #tpu.memory_space<vmem>>, vector<1x32xf32>
    %13 = vector.broadcast %12 : vector<1x32xf32> to vector<16x32xf32>
    %14 = arith.addf %11, %13 : vector<16x32xf32>
    %cst_11 = arith.constant 0.000000e+00 : f32
    %15 = vector.broadcast %cst_11 : f32 to vector<16x32xf32>
    %16 = arith.maximumf %14, %15 : vector<16x32xf32>
    %17 = arith.truncf %16 : vector<16x32xf32> to vector<16x32xbf16>
    %c0_12 = arith.constant 0 : index
    %c0_13 = arith.constant 0 : index
    %18 = vector.load %arg4[%c0_12, %c0_13] : memref<32x32xbf16, #tpu.memory_space<vmem>>, vector<32x32xbf16>
    %cst_14 = arith.constant dense<0.000000e+00> : vector<16x32xf32>
    %19 = tpu.matmul %17, %18, %cst_14 {dimension_numbers = #tpu.dot_dimension_numbers<[1], [0], [0], [1], [0, 0, 1, 1], [], []>} : vector<16x32xbf16>, vector<32x32xbf16>, vector<16x32xf32> -> vector<16x32xf32>
    %c0_15 = arith.constant 0 : index
    %c0_16 = arith.constant 0 : index
    %20 = vector.load %arg8[%c0_15, %c0_16] : memref<1x32xf32, #tpu.memory_space<vmem>>, vector<1x32xf32>
    %21 = vector.broadcast %20 : vector<1x32xf32> to vector<16x32xf32>
    %22 = arith.addf %19, %21 : vector<16x32xf32>
    %cst_17 = arith.constant 0.000000e+00 : f32
    %23 = vector.broadcast %cst_17 : f32 to vector<16x32xf32>
    %24 = arith.maximumf %22, %23 : vector<16x32xf32>
    %25 = arith.truncf %24 : vector<16x32xf32> to vector<16x32xbf16>
    %c0_18 = arith.constant 0 : index
    %c0_19 = arith.constant 0 : index
    %26 = vector.load %arg5[%c0_18, %c0_19] : memref<32x5xbf16, #tpu.memory_space<vmem>>, vector<32x5xbf16>
    %cst_20 = arith.constant dense<0.000000e+00> : vector<16x5xf32>
    %27 = tpu.matmul %25, %26, %cst_20 {dimension_numbers = #tpu.dot_dimension_numbers<[1], [0], [0], [1], [0, 0, 1, 1], [], []>} : vector<16x32xbf16>, vector<32x5xbf16>, vector<16x5xf32> -> vector<16x5xf32>
    %c0_21 = arith.constant 0 : index
    %c0_22 = arith.constant 0 : index
    %28 = vector.load %arg9[%c0_21, %c0_22] : memref<1x5xf32, #tpu.memory_space<vmem>>, vector<1x5xf32>
    %29 = vector.broadcast %28 : vector<1x5xf32> to vector<16x5xf32>
    %30 = arith.addf %27, %29 : vector<16x5xf32>
    %cst_23 = arith.constant dense<0xFF800000> : vector<16xf32>
    %31 = vector.multi_reduction <maximumf>, %30, %cst_23 [1] : vector<16x5xf32> to vector<16xf32>
    %32 = vector.shape_cast %31 : vector<16xf32> to vector<16x1xf32>
    %33 = vector.broadcast %32 : vector<16x1xf32> to vector<16x5xf32>
    %34 = arith.subf %30, %33 : vector<16x5xf32>
    %35 = math.exp %34 : vector<16x5xf32>
    %cst_24 = arith.constant dense<0.000000e+00> : vector<16xf32>
    %36 = vector.multi_reduction <add>, %35, %cst_24 [1] : vector<16x5xf32> to vector<16xf32>
    %37 = vector.shape_cast %36 : vector<16xf32> to vector<16x1xf32>
    %38 = vector.broadcast %37 : vector<16x1xf32> to vector<16x5xf32>
    %39 = arith.divf %35, %38 : vector<16x5xf32>
    %c0_25 = arith.constant 0 : index
    %c0_26 = arith.constant 0 : index
    %40 = vector.load %arg10[%c0_25, %c0_26] : memref<16x5xf32, #tpu.memory_space<vmem>>, vector<16x5xf32>
    tpu.vector_store %arg10[%c0_25, %c0_26], %39 {strides = array<i32>} : memref<16x5xf32, #tpu.memory_space<vmem>>, vector<16x5xf32>,
    return
  }
  func.func @transform_0(%arg0: i32) -> (i32, i32) {
    %c0_i32 = arith.constant 0 : i32
    %c0_i32_0 = arith.constant 0 : i32
    return %arg0, %c0_i32 : i32, i32
  }
  func.func @transform_1(%arg0: i32) -> (i32, i32) {
    %c0_i32 = arith.constant 0 : i32
    %c0_i32_0 = arith.constant 0 : i32
    %c0_i32_1 = arith.constant 0 : i32
    return %c0_i32, %c0_i32_0 : i32, i32
  }
  func.func @transform_2(%arg0: i32) -> (i32, i32) {
    %c0_i32 = arith.constant 0 : i32
    %c0_i32_0 = arith.constant 0 : i32
    %c0_i32_1 = arith.constant 0 : i32
    return %c0_i32, %c0_i32_0 : i32, i32
  }
  func.func @transform_3(%arg0: i32) -> (i32, i32) {
    %c0_i32 = arith.constant 0 : i32
    %c0_i32_0 = arith.constant 0 : i32
    %c0_i32_1 = arith.constant 0 : i32
    return %c0_i32, %c0_i32_0 : i32, i32
  }
  func.func @transform_4(%arg0: i32) -> (i32, i32) {
    %c0_i32 = arith.constant 0 : i32
    %c0_i32_0 = arith.constant 0 : i32
    %c0_i32_1 = arith.constant 0 : i32
    return %c0_i32, %c0_i32_0 : i32, i32
  }
  func.func @transform_5(%arg0: i32) -> (i32, i32) {
    %c0_i32 = arith.constant 0 : i32
    %c0_i32_0 = arith.constant 0 : i32
    %c0_i32_1 = arith.constant 0 : i32
    return %c0_i32, %c0_i32_0 : i32, i32
  }
  func.func @transform_6(%arg0: i32) -> (i32, i32) {
    %c0_i32 = arith.constant 0 : i32
    %c0_i32_0 = arith.constant 0 : i32
    %c0_i32_1 = arith.constant 0 : i32
    return %c0_i32, %c0_i32_0 : i32, i32
  }
  func.func @transform_7(%arg0: i32) -> (i32, i32) {
    %c0_i32 = arith.constant 0 : i32
    %c0_i32_0 = arith.constant 0 : i32
    %c0_i32_1 = arith.constant 0 : i32
    return %c0_i32, %c0_i32_0 : i32, i32
  }
  func.func @transform_8(%arg0: i32) -> (i32, i32) {
    %c0_i32 = arith.constant 0 : i32
    %c0_i32_0 = arith.constant 0 : i32
    %c0_i32_1 = arith.constant 0 : i32
    return %c0_i32, %c0_i32_0 : i32, i32
  }
  func.func @transform_9(%arg0: i32) -> (i32, i32) {
    %c0_i32 = arith.constant 0 : i32
    %c0_i32_0 = arith.constant 0 : i32
    return %arg0, %c0_i32 : i32, i32
  }
}

</mosaic_0001>

<bundles_post_ra>
// kernel: tpu_custom_call.1
= control target key start
LH: loop header
LB: loop body
LE: loop exit
PB: predicated region body
PF: predicated region fallthrough
CT: control target
= control target key end

     0   :  { %s870_s30 = smov 0   ;;  %s959_s0 = inlined_call_operand.vmem [shape: f32[32,40], index: 0, kind: input, shape index: {}]   ;;  %s960_s1 = inlined_call_operand.vmem [shape: bf16[40,32], index: 1, kind: input, shape index: {}]   ;;  %s961_s2 = inlined_call_operand.vmem [shape: bf16[32,32], index: 2, kind: input, shape index: {}]   ;;  %s962_s3 = inlined_call_operand.vmem [shape: bf16[32,32], index: 3, kind: input, shape index: {}]   ;;  %s963_s4 = inlined_call_operand.vmem [shape: bf16[32,5], index: 4, kind: input, shape index: {}]   ;;  %s964_s5 = inlined_call_operand.vmem [shape: f32[1,32], index: 5, kind: input, shape index: {}]   ;;  %s965_s6 = inlined_call_operand.vmem [shape: f32[1,32], index: 6, kind: input, shape index: {}]   ;;  %s966_s7 = inlined_call_operand.vmem [shape: f32[1,32], index: 7, kind: input, shape index: {}]   ;;  %s967_s8 = inlined_call_operand.vmem [shape: f32[1,5], index: 8, kind: input, shape index: {}]   ;;  %s968_s9 = inlined_call_operand.vmem [shape: f32[32,5], index: 9, kind: output, shape index: {}]  }
   0x1 LB: > { %s708_s10 = sadd.s32 4294967295, %s816_s30   ;;  %p712_p0 = scmp.ge.s32.totalorder %s816_s30, 1  ;;  %s816_s30 = sphi %s870_s30, %s19_s30  }
   0x2   : > { %p288_p1 = scmp.lt.s32.totalorder %s816_s30, 3 }
   0x4   : > { %p289_p2 = pnand %p712_p0, %p288_p1 }
   0x5   : > { %v793_v0 = vld [vmem:[%s960_s1] sm:$0xff] (!%p289_p2)   ;;  %v818_v1 = vmov (!%p289_p2), 0.0   ;;  %v794_v2 = vld [vmem:[%s960_s1 + $0x8] sm:$0xff] (!%p289_p2)   ;;  %s713_s15 = sshll.u32 (!%p289_p2), %s708_s10, 1  ;;  %v795_v3 = vld [vmem:[%s960_s1 + $0x10] ss:$0 sps:$4 sm:$0xff] (!%p289_p2)  }
   0x6   : > { %292 = sbr.rel (%p289_p2) target bundleno = 1212 (0x4bc), region = 56  ;;  %749 = vmatprep.subr.bf16.mxu0 (!%p289_p2), %v818_v1  ;;  %759 = vmatprep.subr.bf16.mxu1 (!%p289_p2), %v818_v1  ;;  %vm819_vm0 = vmmov (!%p289_p2), 0   ;;  %p325_p3 = scmp.lt.s32.totalorder (!%p289_p2), %s713_s15, 3  ;;  %vm371_vm1 = vcmask (!%p289_p2), 1043456   ;;  %vm367_vm2 = vcmask (!%p289_p2), 326656   ;;  %v796_v8 = vld [vmem:[%s961_s2] sm:$0xff] (!%p289_p2)  }
   0x7   : > { %750 = vmatpush3.bf16.msra.mxu0 (!%p289_p2), %v793_v0  ;;  %755 = vmatprep.mubr.msk.bf16.mxu0 (!%p289_p2), %vm819_vm0, %v818_v1  ;;  %v373_v4 = vsel (!%p289_p2), %vm371_vm1, %v795_v3, 0  ;;  %v797_v9 = vld [vmem:[%s961_s2 + $0x8] sm:$0xff] (!%p289_p2)   ;;  %v717_v10 = vld [vmem:[%s964_s5] ss:$0 sm:$0xff] (!%p289_p2)  ;;  %vm442_vm3 = vcmask (!%p289_p2), 261120   ;;  %vm627_vm4 = vcmask (!%p289_p2), 39936  }
   0x8   : > { %751 = vmatprep.subr.bf16.mxu0 (!%p289_p2), %v818_v1  ;;  %763 = vmatprep.mubr.msk.bf16.mxu1 (!%p289_p2), %vm819_vm0, %v818_v1  ;;  %v798_v20 = vld [vmem:[%s962_s3] sm:$0xff] (!%p289_p2)   ;;  %v799_v21 = vld [vmem:[%s962_s3 + $0x8] sm:$0xff] (!%p289_p2)  }
   0x9   : > { %760 = vmatpush3.bf16.msra.mxu1 (!%p289_p2), %v796_v8  ;;  %v722_v22 = vld [vmem:[%s965_s6] ss:$0 sm:$0xff] (!%p289_p2)  ;;  %v801_v33 = vld [vmem:[%s963_s4 + $0x8] sm:$0xff] (!%p289_p2)  }
   0xa   : > { %761 = vmatprep.subr.bf16.mxu1 (!%p289_p2), %v818_v1  ;;  %v800_v32 = vld [vmem:[%s963_s4] sm:$0xff] (!%p289_p2)  }
   0xb   : > { %752 = vmatpush3.bf16.msra.mxu0 (!%p289_p2), %v794_v2  ;;  %v726_v34 = vld [vmem:[%s966_s7] ss:$0 sm:$0xff] (!%p289_p2) }
   0xc   : > { %753 = vmatprep.subr.bf16.mxu0 (!%p289_p2), %v818_v1  ;;  %v730_v44 = vld [vmem:[%s967_s8] ss:$0 sm:$0xff] (!%p289_p2) }
   0xd   : > { %s970_s15 = smov (!%p325_p3, %s713_s15), 3  ;;  %762 = vmatpush3.bf16.msra.mxu1 %v797_v9 }
   0xe   : > { %s714_s18 = sshll.u32 %s970_s15, 3  ;;  %767 = vmatprep.subr.bf16.mxu1 %v818_v1 }
   0xf   : > { %s328_s21 = scalar_lea.vmem %s959_s0, %s714_s18  ;;  %754 = vmatpush3.bf16.msra.mxu0 %v373_v4  ;;  %s334_s26 = scalar_lea.vmem %s968_s9, %s714_s18 }
  0x10   : > { %v337_v5 = vld [vmem:[%s328_s21] sm:$0xff]  ;;  %v338_v6 = vld [vmem:[%s328_s21 + $0x8] sm:$0xff]  ;;  %775 = vmatprep.subr.bf16.mxu0 %v818_v1 }
  0x11   : > { %v339_v7 = vpack.c.bf16 %v338_v6, %v337_v5 }
  0x13   : > { %756 = vmatmul.mubr.msk.bf16.vlgmr.msra.gmra.mrb[0].mxu0 %vm367_vm2, %v339_v7 }
  0x14   : > { %779 = vmatprep.mubr.msk.bf16.mxu0 %vm819_vm0, %v818_v1  ;;  %776 = vmatpush3.bf16.msra.mxu0 %v800_v32 }
  0x15   : > { %777 = vmatprep.subr.bf16.mxu0 %v818_v1 }
  0x18   : > { %778 = vmatpush3.bf16.msra.mxu0 %v801_v33 }
  0xe6   : > { %v409_v11 = vpop.f32.mrb[0].mxu0 }
  0xe7   : > { %v410_v12 = vadd.f32 %v717_v10, %v409_v11  ;;  %v757_v13 = vpop.f32.mrb[1].mxu0 }
  0xe8   : > { %v412_v14 = vpop.f32.mrb[2].mxu0 }
  0xe9   : > { %v413_v15 = vadd.f32 %v717_v10, %v412_v14  ;;  %v758_v16 = vpop.f32.mrb[3].mxu0  ;;  %v416_v17 = vmax.f32 %v410_v12, 0.0 }
  0xeb   : > { %v417_v18 = vmax.f32 %v413_v15, 0.0 }
  0xed   : > { %v418_v19 = vpack.c.bf16 %v417_v18, %v416_v17 }
  0xef   : > { %764 = vmatmul.mubr.msk.bf16.vlgmr.msra.gmra.mrb[0].mxu1 %vm442_vm3, %v418_v19 }
  0xf0   : > { %771 = vmatprep.mubr.msk.bf16.mxu1 %vm819_vm0, %v818_v1  ;;  %768 = vmatpush3.bf16.msra.mxu1 %v798_v20 }
  0xf1   : > { %769 = vmatprep.subr.bf16.mxu1 %v818_v1 }
  0xf4   : > { %770 = vmatpush3.bf16.msra.mxu1 %v799_v21 }
 0x1c2   : > { %v480_v23 = vpop.f32.mrb[0].mxu1 }
 0x1c3   : > { %v481_v24 = vadd.f32 %v722_v22, %v480_v23  ;;  %v765_v25 = vpop.f32.mrb[1].mxu1 }
 0x1c4   : > { %v483_v26 = vpop.f32.mrb[2].mxu1 }
 0x1c5   : > { %v484_v27 = vadd.f32 %v722_v22, %v483_v26  ;;  %v766_v28 = vpop.f32.mrb[3].mxu1  ;;  %v487_v29 = vmax.f32 %v481_v24, 0.0 }
 0x1c7   : > { %v488_v30 = vmax.f32 %v484_v27, 0.0 }
 0x1c9   : > { %v489_v31 = vpack.c.bf16 %v488_v30, %v487_v29 }
 0x1cb   : > { %772 = vmatmul.mubr.msk.bf16.vlgmr.msra.gmra.mrb[4].mxu1 %vm442_vm3, %v489_v31 }
 0x29e   : > { %v550_v35 = vpop.f32.mrb[4].mxu1 }
 0x29f   : > { %v551_v36 = vadd.f32 %v726_v34, %v550_v35  ;;  %v773_v37 = vpop.f32.mrb[5].mxu1 }
 0x2a0   : > { %v553_v38 = vpop.f32.mrb[6].mxu1 }
 0x2a1   : > { %v554_v39 = vadd.f32 %v726_v34, %v553_v38  ;;  %v774_v40 = vpop.f32.mrb[7].mxu1  ;;  %v557_v41 = vmax.f32 %v551_v36, 0.0 }
 0x2a3   : > { %v558_v42 = vmax.f32 %v554_v39, 0.0 }
 0x2a5   : > { %v559_v43 = vpack.c.bf16 %v558_v42, %v557_v41 }
 0x2a7   : > { %780 = vmatmul.mubr.msk.bf16.vlgmr.msra.gmra.mrb[4].mxu0 %vm442_vm3, %v559_v43 }
 0x37a   : > { %v620_v45 = vpop.f32.mrb[4].mxu0 }
 0x37b   : > { %v621_v46 = vadd.f32 %v730_v44, %v620_v45  ;;  %v781_v47 = vpop.f32.mrb[5].mxu0 }
 0x37c   : > { %v623_v48 = vpop.f32.mrb[6].mxu0 }
 0x37d   : > { %v624_v49 = vadd.f32 %v730_v44, %v623_v48  ;;  %v782_v50 = vpop.f32.mrb[7].mxu0  ;;  %v628_v51 = vsel %vm627_vm4, %v621_v46, -inf }
 0x37e   : > { %629 = vmax.xlane.f32.xlu0 %v628_v51 }
 0x37f   : > { %v631_v52 = vsel %vm627_vm4, %v624_v49, -inf }
 0x382   : > { %632 = vmax.xlane.f32.xlu0 %v631_v52 }
 0x40b   : > { %v630_v53 = vpop.xlane.xlu0 %629 }
 0x40c   : > { %v634_v54 = vsub.f32 %v621_v46, %v630_v53 }
 0x40e   : > { %v636_v55 = vmul.f32 1.442695, %v634_v54 }
 0x40f   : > { %v633_v56 = vpop.xlane.xlu0 %632 }
 0x410   : > { %802 = vpow2.f32 %v636_v55  ;;  %v635_v57 = vsub.f32 %v624_v49, %v633_v56 }
 0x412   : > { %v638_v58 = vmul.f32 1.442695, %v635_v57 }
 0x414   : > { %804 = vpow2.f32 %v638_v58 }
 0x41a   : > { %v803_v59 = vpop.eup %802 }
 0x41b   : > { %v640_v60 = vsel %vm627_vm4, %v803_v59, 0.0 }
 0x41c   : > { %641 = vadd.xlane.f32.xlu1 %v640_v60 }
 0x41e   : > { %v805_v61 = vpop.eup %804 }
 0x41f   : > { %v643_v62 = vsel %vm627_vm4, %v805_v61, 0.0 }
 0x420   : > { %644 = vadd.xlane.f32.xlu1 %v643_v62 }
 0x4a9   : > { %v642_v63 = vpop.xlane.xlu1 %641 }
 0x4aa   : > { %806 = vrcp.f32 %v642_v63 }
 0x4ad   : > { %v645_v0 = vpop.xlane.xlu1 %644 }
 0x4ae   : > { %808 = vrcp.f32 %v645_v0 }
 0x4b4   : > { %v807_v1 = vpop.eup %806 }
 0x4b5   : > { %v647_v2 = vmul.f32 %v807_v1, %v803_v59 }
 0x4b7   : > { %650 = vst.msk [vmem:[%s334_s26] sm:$0xff] %vm627_vm4, %v647_v2 }
 0x4b8   : > { %v809_v3 = vpop.eup %808 }
 0x4b9   : > { %v649_v4 = vmul.f32 %v809_v3, %v805_v61 }
 0x4bb   : > { %651 = vst.msk [vmem:[%s334_s26 + $0x8] sm:$0xff] %vm627_vm4, %v649_v4 }
 0x4bc PF: > { %s19_s30 = sadd.s32 1, %s816_s30  }
 0x4bd   : > { %p16_p4 = scmp.ge.s32.totalorder %s19_s30, 4  }
 0x4bf   :  { %18 = sbr.rel (!%p16_p4) target bundleno = 1 (0x1), region = 86 }

</bundles_post_ra>
